<compile_context>
chip_gen: v6e
topology: v6e:2x2x1
jax: 0.10.0
libtpu: 0.0.40
codegen_flags: <defaults>
</compile_context>

<pallas_src>
import functools

import jax
import jax.numpy as jnp
from jax.experimental import pallas as pl
from jax.experimental.pallas import tpu as pltpu

LANE = 128
SUBLANE = 8
USE_BF16_MATMUL = True  # bf16 MXU operands, f32 accumulation (native on v6e/v7x)


def _round_up(n, m):
    return ((n + m - 1) // m) * m


def _actor_kernel(x_ref, w0_ref, w1_ref, w2_ref, w3_ref, b_ref, o_ref,
                  *, action_space, bias_offsets, compute_dtype):
    """One batch tile of the fused MLP. All weights/bias are VMEM-resident."""
    o0, o1, o2, o3 = bias_offsets
    h0 = w0_ref.shape[1]
    h1 = w1_ref.shape[1]
    h2 = w2_ref.shape[1]   # 128 (padded from 64)
    h3 = w3_ref.shape[1]   # 128 (padded from action_space)

    x = x_ref[...].astype(compute_dtype)

    # lin0 + ReLU
    h = jnp.dot(x, w0_ref[...], preferred_element_type=jnp.float32)
    h = jnp.maximum(h + b_ref[:, o0:o0 + h0], 0.0)

    # lin1 + ReLU
    h = jnp.dot(h.astype(compute_dtype), w1_ref[...],
                preferred_element_type=jnp.float32)
    h = jnp.maximum(h + b_ref[:, o1:o1 + h1], 0.0)

    # lin2 + ReLU (output lane-padded 64 -> 128; padded lanes stay exactly 0)
    h = jnp.dot(h.astype(compute_dtype), w2_ref[...],
                preferred_element_type=jnp.float32)
    h = jnp.maximum(h + b_ref[:, o2:o2 + h2], 0.0)

    # lin3 + ReLU (output lane-padded action_space -> 128)
    logits = jnp.dot(h.astype(compute_dtype), w3_ref[...],
                     preferred_element_type=jnp.float32)
    logits = jnp.maximum(logits + b_ref[:, o3:o3 + h3], 0.0)

    # Softmax over dim=1, restricted to the `action_space` valid lanes.
    lane = jax.lax.broadcasted_iota(jnp.int32, logits.shape, dimension=1)
    valid = lane < action_space
    logits = jnp.where(valid, logits, -jnp.inf)
    m = jnp.max(logits, axis=-1, keepdims=True)
    e = jnp.where(valid, jnp.exp(logits - m), 0.0)
    denom = jnp.sum(e, axis=-1, keepdims=True)
    p = e * pl.reciprocal(denom, approx=True)

    # x.clamp(min=torch.finfo(float32).eps)
    o_ref[...] = jnp.maximum(p, jnp.finfo(jnp.float32).eps)


def actor_forward(x, params, *, block_b=512):
    """x: (B, input_size) float32. params: list of (W, b) with W (in, out), b (1, out)."""
    assert block_b % SUBLANE == 0
    B, input_size = x.shape
    (W0, b0), (W1, b1), (W2, b2), (W3, b3) = params
    action_space = W3.shape[1]

    # Pad narrow layers to lane-dense widths (zero padding preserves the math:
    # padded hidden units are ReLU(0)=0, padded logits are masked before softmax).
    h2_pad = _round_up(W2.shape[1], LANE)       # 64  -> 128
    out_pad = _round_up(action_space, LANE)     # 4   -> 128
    W2p = jnp.pad(W2, ((0, 0), (0, h2_pad - W2.shape[1])))
    b2p = jnp.pad(b2, ((0, 0), (0, h2_pad - b2.shape[1])))
    W3p = jnp.pad(W3, ((0, h2_pad - W3.shape[0]), (0, out_pad - action_space)))
    b3p = jnp.pad(b3, ((0, 0), (0, out_pad - action_space)))

    compute_dtype = jnp.bfloat16 if USE_BF16_MATMUL else jnp.float32
    ws = [w.astype(compute_dtype) for w in (W0, W1, W2p, W3p)]

    # Pack the four biases into one lane-aligned array (fewer tiny DMAs).
    b_packed = jnp.concatenate([b0, b1, b2p, b3p], axis=1).astype(jnp.float32)
    sizes = (b0.shape[1], b1.shape[1], b2p.shape[1], b3p.shape[1])
    offs = (0, sizes[0], sizes[0] + sizes[1], sizes[0] + sizes[1] + sizes[2])

    # Batch tiling: TB rows per grid step, batch padded to a multiple of TB.
    tb = min(block_b, _round_up(B, SUBLANE))
    bp = _round_up(B, tb)
    xp = jnp.pad(x, ((0, bp - B), (0, 0))) if bp != B else x
    grid = (bp // tb,)

    kernel = functools.partial(
        _actor_kernel,
        action_space=action_space,
        bias_offsets=offs,
        compute_dtype=compute_dtype,
    )

    resident = lambda i: (0, 0)  # weights/bias stay VMEM-resident across grid steps
    out_padded = pl.pallas_call(
        kernel,
        out_shape=jax.ShapeDtypeStruct((bp, out_pad), jnp.float32),
        grid=grid,
        in_specs=[
            pl.BlockSpec((tb, input_size), lambda i: (i, 0)),
            pl.BlockSpec(ws[0].shape, resident),
            pl.BlockSpec(ws[1].shape, resident),
            pl.BlockSpec(ws[2].shape, resident),
            pl.BlockSpec(ws[3].shape, resident),
            pl.BlockSpec(b_packed.shape, resident),
        ],
        out_specs=pl.BlockSpec((tb, out_pad), lambda i: (i, 0)),
        compiler_params=pltpu.CompilerParams(
            dimension_semantics=("parallel",),
        ),
    )(xp, *ws, b_packed)

    return out_padded[:B, :action_space]


def init_params(key, input_size, action_space):
    """Deterministic parameter init (PyTorch-Linear-style uniform)."""
    dims = [input_size, 512, 256, 64, action_space]
    params = []
    for i in range(len(dims) - 1):
        fan_in, fan_out = dims[i], dims[i + 1]
        key, kw, kb = jax.random.split(key, 3)
        bound = 1.0 / (fan_in ** 0.5)
        W = jax.random.uniform(kw, (fan_in, fan_out), jnp.float32, -bound, bound)
        b = jax.random.uniform(kb, (1, fan_out), jnp.float32, -bound, bound)
        params.append((W, b))
    return params


def reference_forward(x, params, compute_dtype=jnp.float32):
    """Pure-JAX reference. compute_dtype emulates the kernel's matmul precision."""
    h = x
    for W, b in params:
        h = jnp.dot(h.astype(compute_dtype), W.astype(compute_dtype),
                    preferred_element_type=jnp.float32) + b
        h = jnp.maximum(h, 0.0)
    p = jax.nn.softmax(h, axis=1)
    return jnp.maximum(p, jnp.finfo(jnp.float32).eps)


if __name__ == "__main__":
    # LunarLander-v2: observation dim = 8, action space = 4.
    INPUT_SHAPE = (8,)
    ACTION_SPACE = 4
    BATCH = 50          # not a multiple of the tile -> exercises batch padding

    input_size = 1
    for d in INPUT_SHAPE:
        input_size *= d

    key = jax.random.PRNGKey(0)
    key, kx = jax.random.split(key)
    x = jax.random.normal(kx, (BATCH, input_size), jnp.float32)
    params = init_params(key, input_size, ACTION_SPACE)

    # Small batch tile so the demo exercises a multi-step grid (2 steps).
    out = actor_forward(x, params, block_b=32)
    out = jax.block_until_ready(out)
    assert out.shape == (BATCH, ACTION_SPACE)

    # Check against a reference using the same matmul precision as the kernel.
    ref_same_prec = reference_forward(
        x, params,
        compute_dtype=jnp.bfloat16 if USE_BF16_MATMUL else jnp.float32)
    assert jnp.allclose(out, ref_same_prec, atol=1e-2, rtol=1e-2), \
        "mismatch vs same-precision reference"

    # Loose sanity check against the full-f32 (PyTorch-equivalent) forward.
    ref_f32 = reference_forward(x, params, compute_dtype=jnp.float32)
    assert jnp.allclose(out, ref_f32, atol=6e-2, rtol=0.0), \
        "mismatch vs f32 reference"

    print("KERNEL_OK")
</pallas_src>

<mosaic_0001>
module attributes {stable_mosaic.version = 11 : i64} {
  func.func @_actor_kernel(%arg0: i32, %arg1: memref<32x8xf32, #tpu.memory_space<vmem>>, %arg2: memref<8x512xbf16, #tpu.memory_space<vmem>>, %arg3: memref<512x256xbf16, #tpu.memory_space<vmem>>, %arg4: memref<256x128xbf16, #tpu.memory_space<vmem>>, %arg5: memref<128x128xbf16, #tpu.memory_space<vmem>>, %arg6: memref<1x1024xf32, #tpu.memory_space<vmem>>, %arg7: memref<32x128xf32, #tpu.memory_space<vmem>>) attributes {dimension_semantics = [#tpu.dimension_semantics<parallel>], iteration_bounds = array<i64: 2>, scalar_prefetch = 0 : i64, scratch_operands = 0 : i64, tpu.core_type = #tpu.core_type<tc>, window_params = [{transform_indices = @transform_0, window_bounds = array<i64: 32, 8>}, {pipeline_mode = #tpu.pipeline_mode<synchronous>, transform_indices = @transform_1, window_bounds = array<i64: 8, 512>}, {pipeline_mode = #tpu.pipeline_mode<synchronous>, transform_indices = @transform_2, window_bounds = array<i64: 512, 256>}, {pipeline_mode = #tpu.pipeline_mode<synchronous>, transform_indices = @transform_3, window_bounds = array<i64: 256, 128>}, {pipeline_mode = #tpu.pipeline_mode<synchronous>, transform_indices = @transform_4, window_bounds = array<i64: 128, 128>}, {pipeline_mode = #tpu.pipeline_mode<synchronous>, transform_indices = @transform_5, window_bounds = array<i64: 1, 1024>}, {transform_indices = @transform_6, window_bounds = array<i64: 32, 128>}]} {
    %c0 = arith.constant 0 : index
    %c0_0 = arith.constant 0 : index
    %0 = vector.load %arg1[%c0, %c0_0] : memref<32x8xf32, #tpu.memory_space<vmem>>, vector<32x8xf32>
    %1 = arith.truncf %0 : vector<32x8xf32> to vector<32x8xbf16>
    %c0_1 = arith.constant 0 : index
    %c0_2 = arith.constant 0 : index
    %2 = vector.load %arg2[%c0_1, %c0_2] : memref<8x512xbf16, #tpu.memory_space<vmem>>, vector<8x512xbf16>
    %cst = arith.constant dense<0.000000e+00> : vector<32x512xf32>
    %3 = tpu.matmul %1, %2, %cst {dimension_numbers = #tpu.dot_dimension_numbers<[1], [0], [0], [1], [0, 0, 1, 1], [], []>} : vector<32x8xbf16>, vector<8x512xbf16>, vector<32x512xf32> -> vector<32x512xf32>
    %c0_3 = arith.constant 0 : index
    %c0_4 = arith.constant 0 : index
    %4 = vector.load %arg6[%c0_3, %c0_4] : memref<1x1024xf32, #tpu.memory_space<vmem>>, vector<1x512xf32>
    %5 = vector.broadcast %4 : vector<1x512xf32> to vector<32x512xf32>
    %6 = arith.addf %3, %5 : vector<32x512xf32>
    %cst_5 = arith.constant 0.000000e+00 : f32
    %7 = vector.broadcast %cst_5 : f32 to vector<32x512xf32>
    %8 = arith.maximumf %6, %7 : vector<32x512xf32>
    %9 = arith.truncf %8 : vector<32x512xf32> to vector<32x512xbf16>
    %c0_6 = arith.constant 0 : index
    %c0_7 = arith.constant 0 : index
    %10 = vector.load %arg3[%c0_6, %c0_7] : memref<512x256xbf16, #tpu.memory_space<vmem>>, vector<512x256xbf16>
    %cst_8 = arith.constant dense<0.000000e+00> : vector<32x256xf32>
    %11 = tpu.matmul %9, %10, %cst_8 {dimension_numbers = #tpu.dot_dimension_numbers<[1], [0], [0], [1], [0, 0, 1, 1], [], []>} : vector<32x512xbf16>, vector<512x256xbf16>, vector<32x256xf32> -> vector<32x256xf32>
    %c0_9 = arith.constant 0 : index
    %c512 = arith.constant 512 : index
    %12 = vector.load %arg6[%c0_9, %c512] : memref<1x1024xf32, #tpu.memory_space<vmem>>, vector<1x256xf32>
    %13 = vector.broadcast %12 : vector<1x256xf32> to vector<32x256xf32>
    %14 = arith.addf %11, %13 : vector<32x256xf32>
    %cst_10 = arith.constant 0.000000e+00 : f32
    %15 = vector.broadcast %cst_10 : f32 to vector<32x256xf32>
    %16 = arith.maximumf %14, %15 : vector<32x256xf32>
    %17 = arith.truncf %16 : vector<32x256xf32> to vector<32x256xbf16>
    %c0_11 = arith.constant 0 : index
    %c0_12 = arith.constant 0 : index
    %18 = vector.load %arg4[%c0_11, %c0_12] : memref<256x128xbf16, #tpu.memory_space<vmem>>, vector<256x128xbf16>
    %cst_13 = arith.constant dense<0.000000e+00> : vector<32x128xf32>
    %19 = tpu.matmul %17, %18, %cst_13 {dimension_numbers = #tpu.dot_dimension_numbers<[1], [0], [0], [1], [0, 0, 1, 1], [], []>} : vector<32x256xbf16>, vector<256x128xbf16>, vector<32x128xf32> -> vector<32x128xf32>
    %c0_14 = arith.constant 0 : index
    %c768 = arith.constant 768 : index
    %20 = vector.load %arg6[%c0_14, %c768] : memref<1x1024xf32, #tpu.memory_space<vmem>>, vector<1x128xf32>
    %21 = vector.broadcast %20 : vector<1x128xf32> to vector<32x128xf32>
    %22 = arith.addf %19, %21 : vector<32x128xf32>
    %cst_15 = arith.constant 0.000000e+00 : f32
    %23 = vector.broadcast %cst_15 : f32 to vector<32x128xf32>
    %24 = arith.maximumf %22, %23 : vector<32x128xf32>
    %25 = arith.truncf %24 : vector<32x128xf32> to vector<32x128xbf16>
    %c0_16 = arith.constant 0 : index
    %c0_17 = arith.constant 0 : index
    %26 = vector.load %arg5[%c0_16, %c0_17] : memref<128x128xbf16, #tpu.memory_space<vmem>>, vector<128x128xbf16>
    %cst_18 = arith.constant dense<0.000000e+00> : vector<32x128xf32>
    %27 = tpu.matmul %25, %26, %cst_18 {dimension_numbers = #tpu.dot_dimension_numbers<[1], [0], [0], [1], [0, 0, 1, 1], [], []>} : vector<32x128xbf16>, vector<128x128xbf16>, vector<32x128xf32> -> vector<32x128xf32>
    %c0_19 = arith.constant 0 : index
    %c896 = arith.constant 896 : index
    %28 = vector.load %arg6[%c0_19, %c896] : memref<1x1024xf32, #tpu.memory_space<vmem>>, vector<1x128xf32>
    %29 = vector.broadcast %28 : vector<1x128xf32> to vector<32x128xf32>
    %30 = arith.addf %27, %29 : vector<32x128xf32>
    %cst_20 = arith.constant 0.000000e+00 : f32
    %31 = vector.broadcast %cst_20 : f32 to vector<32x128xf32>
    %32 = arith.maximumf %30, %31 : vector<32x128xf32>
    %33 = tpu.iota {dimensions = array<i32: 1>} : vector<32x128xi32>
    %c4_i32 = arith.constant 4 : i32
    %34 = vector.broadcast %c4_i32 : i32 to vector<32x128xi32>
    %35 = arith.cmpi slt, %33, %34 : vector<32x128xi32>
    %cst_21 = arith.constant 0xFF800000 : f32
    %36 = vector.broadcast %cst_21 : f32 to vector<32x128xf32>
    %37 = arith.select %35, %32, %36 : vector<32x128xi1>, vector<32x128xf32>
    %cst_22 = arith.constant dense<0xFF800000> : vector<32xf32>
    %38 = vector.multi_reduction <maximumf>, %37, %cst_22 [1] : vector<32x128xf32> to vector<32xf32>
    %39 = vector.shape_cast %38 : vector<32xf32> to vector<32x1xf32>
    %40 = vector.broadcast %39 : vector<32x1xf32> to vector<32x128xf32>
    %41 = arith.subf %37, %40 : vector<32x128xf32>
    %42 = math.exp %41 : vector<32x128xf32>
    %cst_23 = arith.constant 0.000000e+00 : f32
    %43 = vector.broadcast %cst_23 : f32 to vector<32x128xf32>
    %44 = arith.select %35, %42, %43 : vector<32x128xi1>, vector<32x128xf32>
    %cst_24 = arith.constant dense<0.000000e+00> : vector<32xf32>
    %45 = vector.multi_reduction <add>, %44, %cst_24 [1] : vector<32x128xf32> to vector<32xf32>
    %46 = vector.shape_cast %45 : vector<32xf32> to vector<32x1xf32>
    %47 = tpu.reciprocal %46 {approx = true} : vector<32x1xf32> -> vector<32x1xf32>
    %48 = vector.broadcast %47 : vector<32x1xf32> to vector<32x128xf32>
    %49 = arith.mulf %44, %48 : vector<32x128xf32>
    %cst_25 = arith.constant 1.1920929E-7 : f32
    %50 = vector.broadcast %cst_25 : f32 to vector<32x128xf32>
    %51 = arith.maximumf %49, %50 : vector<32x128xf32>
    %c0_26 = arith.constant 0 : index
    %c0_27 = arith.constant 0 : index
    %52 = vector.load %arg7[%c0_26, %c0_27] : memref<32x128xf32, #tpu.memory_space<vmem>>, vector<32x128xf32>
    tpu.vector_store %arg7[%c0_26, %c0_27], %51 {strides = array<i32>} : memref<32x128xf32, #tpu.memory_space<vmem>>, vector<32x128xf32>,
    return
  }
  func.func @transform_0(%arg0: i32) -> (i32, i32) {
    %c0_i32 = arith.constant 0 : i32
    %c0_i32_0 = arith.constant 0 : i32
    return %arg0, %c0_i32 : i32, i32
  }
  func.func @transform_1(%arg0: i32) -> (i32, i32) {
    %c0_i32 = arith.constant 0 : i32
    %c0_i32_0 = arith.constant 0 : i32
    %c0_i32_1 = arith.constant 0 : i32
    return %c0_i32, %c0_i32_0 : i32, i32
  }
  func.func @transform_2(%arg0: i32) -> (i32, i32) {
    %c0_i32 = arith.constant 0 : i32
    %c0_i32_0 = arith.constant 0 : i32
    %c0_i32_1 = arith.constant 0 : i32
    return %c0_i32, %c0_i32_0 : i32, i32
  }
  func.func @transform_3(%arg0: i32) -> (i32, i32) {
    %c0_i32 = arith.constant 0 : i32
    %c0_i32_0 = arith.constant 0 : i32
    %c0_i32_1 = arith.constant 0 : i32
    return %c0_i32, %c0_i32_0 : i32, i32
  }
  func.func @transform_4(%arg0: i32) -> (i32, i32) {
    %c0_i32 = arith.constant 0 : i32
    %c0_i32_0 = arith.constant 0 : i32
    %c0_i32_1 = arith.constant 0 : i32
    return %c0_i32, %c0_i32_0 : i32, i32
  }
  func.func @transform_5(%arg0: i32) -> (i32, i32) {
    %c0_i32 = arith.constant 0 : i32
    %c0_i32_0 = arith.constant 0 : i32
    %c0_i32_1 = arith.constant 0 : i32
    return %c0_i32, %c0_i32_0 : i32, i32
  }
  func.func @transform_6(%arg0: i32) -> (i32, i32) {
    %c0_i32 = arith.constant 0 : i32
    %c0_i32_0 = arith.constant 0 : i32
    return %arg0, %c0_i32 : i32, i32
  }
}

</mosaic_0001>

<bundles_post_ra>
// kernel: tpu_custom_call.1
= control target key start
LH: loop header
LB: loop body
LE: loop exit
PB: predicated region body
PF: predicated region fallthrough
CT: control target
= control target key end

     0   :  { %11 = vsyncpa [#allocation3], 0  ;;  %s2284_s0 = inlined_call_operand.vmem [shape: f32[64,8], index: 0, kind: input, shape index: {}]   ;;  %s2285_s1 = inlined_call_operand.hbm [shape: bf16[8,512], index: 1, kind: input, shape index: {}]   ;;  %s2286_s2 = inlined_call_operand.hbm [shape: bf16[512,256], index: 2, kind: input, shape index: {}]   ;;  %s2287_s3 = inlined_call_operand.hbm [shape: bf16[256,128], index: 3, kind: input, shape index: {}]   ;;  %s2288_s4 = inlined_call_operand.vmem [shape: bf16[128,128], index: 4, kind: input, shape index: {}]   ;;  %s2289_s5 = inlined_call_operand.vmem [shape: f32[1,1024], index: 5, kind: input, shape index: {}]   ;;  %s2290_s6 = inlined_call_operand.hbm [shape: f32[64,128], index: 6, kind: output, shape index: {}]  }
   0x1   :  { %12 = vsyncpa [#allocation6], 0 }
   0x2   :  { %13 = vsyncpa [#allocation4], 0 }
   0x3   :  { %15 = vsyncpa [#allocation4 + $0x1], 0  ;;  %s2064_s21 = smov 0   ;;  %s2066_s22 = smov 0  }
   0x4   :  { %s2068_s23 = smov 0   ;;  %s2070_s24 = smov 0  }
   0x5 LB: > { %s2085_s25 = sadd.s32 4294967295, %s2016_s24   ;;  %s1476_s26 = sadd.s32 4294967294, %s2016_s24   ;;  %s2016_s24 = sphi %s2070_s24, %s2306_s24   ;;  %s2012_s23 = sphi %s2068_s23, %s2305_s23   ;;  %s2008_s22 = sphi %s2066_s22, %s2304_s22   ;;  %s2004_s21 = sphi %s2064_s21, %s2303_s21  }
   0x6   : > { %s2089_s27 = sadd.s32 1, %s2016_s24   ;;  %s159_s28 = sadd.s32 1, %s2012_s23 }
   0x7   : > { %s156_s29 = ssub.s32 %s2016_s24, %s2089_s27  ;;  %p169_p0 = scmp.ne.s32.totalorder %s2012_s23, %s2008_s22 }
   0x8   : > { %p157_p1 = scmp.eq.s32.totalorder %s156_s29, 0  ;;  %p170_p2 = scmp.eq.s32.totalorder %s2085_s25, 1 }
   0x9   : > { %p175_p3 = scmp.ne.s32.totalorder %s2008_s22, %s2004_s21  ;;  %p176_p4 = scmp.eq.s32.totalorder %s1476_s26, 1 }
   0xa   : > { %s2100_s30 = scalar_select %p157_p1, %s2012_s23, %s159_s28  }
   0xb   : > { %p2102_p5 = por %p170_p2, %p169_p0  ;;  %p2106_p6 = por %p176_p4, %p175_p3 }
   0xc   : > { %p1477_p7 = scmp.ge.s32.totalorder %s2016_s24, 1  ;;  %p183_p8 = scmp.lt.s32.totalorder %s2016_s24, 3 }
   0xd   : > { %s2293_s7 = scalar_select %p2102_p5, 1, 0 }
   0xe   : > { %s2294_s8 = scalar_select %p2106_p6, 1, 0 }
   0xf   : > { %p2291_p9 = scmp.eq.s32.totalorder %s2085_s25, 0  ;;  %p2113_p10 = pnand %p1477_p7, %p183_p8 }
  0x10   : > { %s2018_s10 = smov [#allocation5]   ;;  %s2019_s13 = smov [#allocation2]  }
  0x11   : > { %s206_s11 = sshll.u32 %s2018_s10, 4  ;;  %p1667_p11 = pneg %p2113_p10  ;;  %s207_s11 = int_to_ptr.vmem [resolvable:$true] %s206_s11 }
  0x12   : > { %s196_s14 = sshll.u32 %s2019_s13, 4  ;;  %s2020_s15 = smov [#allocation7]   ;;  %s197_s14 = int_to_ptr.vmem [resolvable:$true] %s196_s14 }
  0x13   : > { %p2121_p12 = pnand %p2291_p9, %p1667_p11  ;;  %s219_s16 = sshll.u32 %s2020_s15, 4  ;;  %s220_s16 = int_to_ptr.vmem [resolvable:$true] %s219_s16 }
  0x14   : > { %s1881_s17 = scalar_lea.vmem %s207_s11, 8192  ;;  %p1889_p3 = scmp.lt.s32.totalorder %s207_s11, %s207_s11 }
  0x15   : > { %p1872_p13 = pneg %p2121_p12  ;;  %p1882_p0 = scmp.ne.s32.totalorder %s207_s11, %s1881_s17 }
  0x16   : > { %p1890_p4 = scmp.lt.s32.totalorder %s1881_s17, %s1881_s17 }
  0x17   : > { %p1884_p1 = pnand %p1882_p0, %p1872_p13 }
  0x18   : > { %p1891_p7 = por %p1890_p4, %p1889_p3 }
  0x19   : > { %p1885_p2 = pneg %p1884_p1 }
  0x1b   : > { %p1892_p8 = pnand %p1891_p7, %p1885_p2 }
  0x1d   : > { %1895 = shalt.err (!%p1892_p8)
}
  0x1e   : > { %s2021_s18 = smov 128   ;;  %s2022_s19 = smov 8  }
  0x1f   : > { %1673 = dma.hbm_to_vmem [thread:$0]  (!%p2121_p12), %s2286_s2, 8192, %s207_s11, [#allocation6], %s2021_s18, %s2021_s18, %s2022_s19  }
  0x20   : > { %s1907_s28 = scalar_lea.vmem %s197_s14, 256  ;;  %p1915_p9 = scmp.lt.s32.totalorder %s197_s14, %s197_s14 }
  0x21   : > { %p1908_p11 = scmp.ne.s32.totalorder %s197_s14, %s1907_s28  ;;  %p1916_p6 = scmp.lt.s32.totalorder %s1907_s28, %s1907_s28 }
  0x23   : > { %p1910_p0 = pnand %p1908_p11, %p1872_p13  ;;  %p1917_p3 = por %p1916_p6, %p1915_p9 }
  0x25   : > { %p1911_p1 = pneg %p1910_p0 }
  0x27   : > { %p1918_p2 = pnand %p1917_p3, %p1911_p1 }
  0x29   : > { %1921 = shalt.err (!%p1918_p2)
}
  0x2a   : > { %1670 = dma.hbm_to_vmem [thread:$0]  (!%p2121_p12), %s2285_s1, 256, %s197_s14, [#allocation3]  }
  0x2b   : > { %s1933_s11 = scalar_lea.vmem %s220_s16, 2048  ;;  %p1941_p11 = scmp.lt.s32.totalorder %s220_s16, %s220_s16 }
  0x2c   : > { %p1934_p4 = scmp.ne.s32.totalorder %s220_s16, %s1933_s11  ;;  %p1942_p0 = scmp.lt.s32.totalorder %s1933_s11, %s1933_s11 }
  0x2e   : > { %p1936_p7 = pnand %p1934_p4, %p1872_p13  ;;  %p1943_p5 = por %p1942_p0, %p1941_p11 }
  0x30   : > { %p1937_p8 = pneg %p1936_p7 }
  0x32   : > { %p1944_p6 = pnand %p1943_p5, %p1937_p8 }
  0x34   : > { %1947 = shalt.err (!%p1944_p6)
}
  0x35   : > { %s2023_s13 = smov 64   ;;  %s2024_s15 = smov 4  }
  0x36   : > { %1676 = dma.hbm_to_vmem [thread:$0]  (!%p2121_p12), %s2287_s3, 2048, %s220_s16, [#allocation6], %s2023_s13, %s2023_s13, %s2024_s15  }
  0x37   : > { %250 = sbr.rel (%p2113_p10) target bundleno = 1237 (0x4d5), region = 44  ;;  %p2297_p9 = scmp.eq.s32.totalorder (!%p2113_p10), %s2085_s25, 0 }
  0x3c   : > { %1991 = dma.done.wait (%p2297_p9), [#allocation3], 256   ;;  %p2298_p13 = pmov %p2297_p9 }
  0x3d   : > { %p2299_p5 = pmov %p2297_p9 }
  0x3e   : > { %1993 = vsyncadd (%p2298_p13), [#allocation3], 4294967040 }
  0x3f   : > { %1995 = dma.done.wait (%p2299_p5), [#allocation6], 10240   ;;  %p2300_p1 = pmov %p2299_p5 }
  0x40   : > { %s1487_s12 = sshll.u32 %s2085_s25, 2  ;;  %v2025_v0 = vmov 0   ;;  %v302_v1 = vld [vmem:[#allocation2] sm:$0xff]  ;;  %vm343_vm0 = vcmask 1043456   ;;  %v303_v2 = vld [vmem:[#allocation2 + $0x8] sm:$0xff]  ;;  %vm336_vm1 = vcmask 64512  }
  0x41   : > { %1997 = vsyncadd (%p2300_p1), [#allocation6], 4294957056  ;;  %388 = vmatprep.mubr.bf16.mxu0 %v2025_v0  ;;  %441 = vmatprep.mubr.bf16.mxu1 %v2025_v0  ;;  %p289_p12 = scmp.lt.s32.totalorder %s1487_s12, 7  ;;  %v1490_v4 = vcombine.high %v302_v1, %v302_v1  ;;  %v1492_v5 = vcombine.high %v303_v2, %v303_v2  ;;  %v1489_v6 = vcombine.low %v302_v1, %v302_v1  ;;  %v1736_v12 = vld [vmem:[#allocation5 + $0x74] ss:$8 sps:$4 sm:$0xff]   ;;  %s285_s18 = sand.u32 1, %s2008_s22  }
  0x42   : > { %v1491_v7 = vcombine.low %v303_v2, %v303_v2  ;;  %v1739_v13 = vld [vmem:[#allocation5 + $0x174] ss:$8 sps:$4 sm:$0xff]   ;;  %v1734_v14 = vld [vmem:[#allocation5 + $0x70] ss:$8 sps:$4 sm:$0xff]   ;;  %v1742_v17 = vld [vmem:[#allocation5 + $0x64] ss:$8 sps:$4 sm:$0xff]  }
  0x43   : > { %s2308_s12 = smov (!%p289_p12, %s1487_s12), 7  ;;  %1493 = vmatprep.subr.msk.bf16.mxu0 %vm343_vm0, %v1490_v4  ;;  %1496 = vmatprep.subr.msk.bf16.mxu1 %vm343_vm0, %v1492_v5  ;;  %v345_v9 = vsel %vm343_vm0, %v1489_v6, 0  ;;  %v1737_v15 = vld [vmem:[#allocation5 + $0x170] ss:$8 sps:$4 sm:$0xff]   ;;  %v1745_v18 = vld [vmem:[#allocation5 + $0x164] ss:$8 sps:$4 sm:$0xff]  }
  0x44   : > { %s1488_s9 = sshll.u32 %s2308_s12, 3  ;;  %v351_v10 = vsel %vm343_vm0, %v1491_v7, 0  ;;  %371 = vmatpush1.bf16.msra.mxu0 %v345_v9  ;;  %v1740_v20 = vld [vmem:[#allocation5 + $0x60] ss:$8 sps:$4 sm:$0xff]   ;;  %v1748_v22 = vld [vmem:[#allocation5 + $0x54] ss:$8 sps:$4 sm:$0xff]  }
  0x45   : > { %s2165_s19 = scalar_lea.vmem %s2284_s0, %s1488_s9  ;;  %424 = vmatpush1.bf16.msra.mxu1 %v351_v10  ;;  %882 = vmatprep.subr.bf16.mxu0 %v1736_v12  ;;  %v1743_v21 = vld [vmem:[#allocation5 + $0x160] ss:$8 sps:$4 sm:$0xff]   ;;  %v1751_v23 = vld [vmem:[#allocation5 + $0x154] ss:$8 sps:$4 sm:$0xff]   ;;  %v1746_v25 = vld [vmem:[#allocation5 + $0x50] ss:$8 sps:$4 sm:$0xff]  }
  0x46   : > { %v296_v3 = vld [vmem:[%s2165_s19] sm:$0xff]  ;;  %v297_v8 = vld [vmem:[%s2165_s19 + $0x8] sm:$0xff]  ;;  %v298_v16 = vld [vmem:[%s2165_s19 + $0x10] sm:$0xff]  ;;  %935 = vmatprep.subr.bf16.mxu1 %v1739_v13  ;;  %s1486_s12 = sshll.u32 %s285_s18, 5  ;;  %s1594_s14 = sshll.u32 %s2085_s25, 9 }
  0x47   : > { %v300_v11 = vpack.c.bf16 %v297_v8, %v296_v3  ;;  %v299_v19 = vld [vmem:[%s2165_s19 + $0x18] sm:$0xff]  ;;  %v1749_v26 = vld [vmem:[#allocation5 + $0x150] ss:$8 sps:$4 sm:$0xff]   ;;  %v1760_v31 = vld [vmem:[#allocation5 + $0x34] ss:$8 sps:$4 sm:$0xff]   ;;  %s287_s9 = scalar_lea.vmem [#allocation8], %s1486_s12  ;;  %s2240_s26 = scalar_lea.hbm %s2290_s6, %s1594_s14 }
  0x48   : > { %v301_v24 = vpack.c.bf16 %v299_v19, %v298_v16  ;;  %v1754_v27 = vld [vmem:[#allocation5 + $0x44] ss:$8 sps:$4 sm:$0xff]   ;;  %v1752_v29 = vld [vmem:[#allocation5 + $0x40] ss:$8 sps:$4 sm:$0xff]   ;;  %v1763_v32 = vld [vmem:[#allocation5 + $0x134] ss:$8 sps:$4 sm:$0xff]   ;;  %v306_v16 = vlaneseq }
  0x49   : > { %1494 = vmatmul.mubr.msk.bf16.vlgmr.msra.gmra.mxu0 %vm336_vm1, %v300_v11  ;;  %1497 = vmatmul.mubr.msk.bf16.vlgmr.msra.gmra.mxu1 %vm336_vm1, %v300_v11  ;;  %v1757_v28 = vld [vmem:[#allocation5 + $0x144] ss:$8 sps:$4 sm:$0xff]   ;;  %v1755_v30 = vld [vmem:[#allocation5 + $0x140] ss:$8 sps:$4 sm:$0xff]   ;;  %v1758_v33 = vld [vmem:[#allocation5 + $0x30] ss:$8 sps:$4 sm:$0xff]  }
  0x4a   : > { %398 = vmatprep.mubr.bf16.mxu0 %v2025_v0  ;;  %451 = vmatprep.mubr.bf16.mxu1 %v2025_v0  ;;  %v1761_v34 = vld [vmem:[#allocation5 + $0x130] ss:$8 sps:$4 sm:$0xff]   ;;  %v1766_v35 = vld [vmem:[#allocation5 + $0x24] ss:$8 sps:$4 sm:$0xff]   ;;  %v1764_v37 = vld [vmem:[#allocation5 + $0x20] ss:$8 sps:$4 sm:$0xff]  }
  0x4b   : > { %883 = vmatpush1.bf16.msra.mxu0 %v1734_v14  ;;  %936 = vmatpush1.bf16.msra.mxu1 %v1737_v15  ;;  %v1769_v36 = vld [vmem:[#allocation5 + $0x124] ss:$8 sps:$4 sm:$0xff]   ;;  %v1767_v38 = vld [vmem:[#allocation5 + $0x120] ss:$8 sps:$4 sm:$0xff]   ;;  %v1772_v39 = vld [vmem:[#allocation5 + $0x14] ss:$8 sps:$4 sm:$0xff]  }
  0x4c   : > { %884 = vmatprep.subr.bf16.mxu0 %v1742_v17  ;;  %937 = vmatprep.subr.bf16.mxu1 %v1745_v18  ;;  %v1775_v40 = vld [vmem:[#allocation5 + $0x114] ss:$8 sps:$4 sm:$0xff]   ;;  %v1770_v41 = vld [vmem:[#allocation5 + $0x10] ss:$8 sps:$4 sm:$0xff]   ;;  %v1778_v43 = vld [vmem:[#allocation5 + $0x4] ss:$8 sps:$4 sm:$0xff]  }
  0x4d   : > { %v1773_v42 = vld [vmem:[#allocation5 + $0x110] ss:$8 sps:$4 sm:$0xff]   ;;  %v1781_v44 = vld [vmem:[#allocation5 + $0x104] ss:$8 sps:$4 sm:$0xff]   ;;  %v1776_v45 = vld [vmem:[#allocation5] ss:$8 sps:$4 sm:$0xff]  }
  0x4e   : > { %v1779_v46 = vld [vmem:[#allocation5 + $0x100] ss:$8 sps:$4 sm:$0xff]   ;;  %v1784_v47 = vld [vmem:[#allocation5 + $0xf4] ss:$8 sps:$4 sm:$0xff]   ;;  %v1782_v49 = vld [vmem:[#allocation5 + $0xf0] ss:$8 sps:$4 sm:$0xff]  }
  0x4f   : > { %885 = vmatpush1.bf16.msra.mxu0 %v1740_v20  ;;  %938 = vmatpush1.bf16.msra.mxu1 %v1743_v21  ;;  %v1787_v48 = vld [vmem:[#allocation5 + $0x1f4] ss:$8 sps:$4 sm:$0xff]   ;;  %v1785_v50 = vld [vmem:[#allocation5 + $0x1f0] ss:$8 sps:$4 sm:$0xff]   ;;  %v1790_v51 = vld [vmem:[#allocation5 + $0xe4] ss:$8 sps:$4 sm:$0xff]  }
  0x50   : > { %886 = vmatprep.subr.bf16.mxu0 %v1748_v22  ;;  %939 = vmatprep.subr.bf16.mxu1 %v1751_v23  ;;  %v1793_v52 = vld [vmem:[#allocation5 + $0x1e4] ss:$8 sps:$4 sm:$0xff]   ;;  %v1788_v53 = vld [vmem:[#allocation5 + $0xe0] ss:$8 sps:$4 sm:$0xff]   ;;  %v1796_v55 = vld [vmem:[#allocation5 + $0xd4] ss:$8 sps:$4 sm:$0xff]  }
  0x51   : > { %1495 = vmatmul.mubr.msk.bf16.gmra.mxu0 %vm336_vm1, %v301_v24  ;;  %1498 = vmatmul.mubr.msk.bf16.gmra.mxu1 %vm336_vm1, %v301_v24  ;;  %v1791_v54 = vld [vmem:[#allocation5 + $0x1e0] ss:$8 sps:$4 sm:$0xff]   ;;  %v1799_v56 = vld [vmem:[#allocation5 + $0x1d4] ss:$8 sps:$4 sm:$0xff]   ;;  %v1794_v57 = vld [vmem:[#allocation5 + $0xd0] ss:$8 sps:$4 sm:$0xff]  }
  0x52   : > { %v1797_v58 = vld [vmem:[#allocation5 + $0x1d0] ss:$8 sps:$4 sm:$0xff]   ;;  %v1802_v59 = vld [vmem:[#allocation5 + $0xc4] ss:$8 sps:$4 sm:$0xff]   ;;  %v1800_v61 = vld [vmem:[#allocation5 + $0xc0] ss:$8 sps:$4 sm:$0xff]  }
  0x53   : > { %887 = vmatpush1.bf16.msra.mxu0 %v1746_v25  ;;  %940 = vmatpush1.bf16.msra.mxu1 %v1749_v26  ;;  %v1805_v60 = vld [vmem:[#allocation5 + $0x1c4] ss:$8 sps:$4 sm:$0xff]   ;;  %v1803_v62 = vld [vmem:[#allocation5 + $0x1c0] ss:$8 sps:$4 sm:$0xff]   ;;  %v1808_v63 = vld [vmem:[#allocation5 + $0xb4] ss:$8 sps:$4 sm:$0xff]  }
  0x54   : > { %888 = vmatprep.subr.bf16.mxu0 %v1754_v27  ;;  %941 = vmatprep.subr.bf16.mxu1 %v1757_v28  ;;  %v1811_v0 = vld [vmem:[#allocation5 + $0x1b4] ss:$8 sps:$4 sm:$0xff]   ;;  %v1806_v1 = vld [vmem:[#allocation5 + $0xb0] ss:$8 sps:$4 sm:$0xff]   ;;  %v1814_v3 = vld [vmem:[#allocation5 + $0xa4] ss:$8 sps:$4 sm:$0xff]  }
  0x55   : > { %v1809_v2 = vld [vmem:[#allocation5 + $0x1b0] ss:$8 sps:$4 sm:$0xff]   ;;  %v1817_v4 = vld [vmem:[#allocation5 + $0x1a4] ss:$8 sps:$4 sm:$0xff]   ;;  %v1812_v5 = vld [vmem:[#allocation5 + $0xa0] ss:$8 sps:$4 sm:$0xff]  }
  0x56   : > { %v1815_v6 = vld [vmem:[#allocation5 + $0x1a0] ss:$8 sps:$4 sm:$0xff]   ;;  %v1820_v7 = vld [vmem:[#allocation5 + $0x94] ss:$8 sps:$4 sm:$0xff]   ;;  %v1818_v9 = vld [vmem:[#allocation5 + $0x90] ss:$8 sps:$4 sm:$0xff]  }
  0x57   : > { %889 = vmatpush1.bf16.msra.mxu0 %v1752_v29  ;;  %942 = vmatpush1.bf16.msra.mxu1 %v1755_v30  ;;  %v1823_v8 = vld [vmem:[#allocation5 + $0x194] ss:$8 sps:$4 sm:$0xff]   ;;  %v1821_v10 = vld [vmem:[#allocation5 + $0x190] ss:$8 sps:$4 sm:$0xff]   ;;  %v1826_v11 = vld [vmem:[#allocation5 + $0x84] ss:$8 sps:$4 sm:$0xff]  }
  0x58   : > { %890 = vmatprep.subr.bf16.mxu0 %v1760_v31  ;;  %943 = vmatprep.subr.bf16.mxu1 %v1763_v32  ;;  %v1829_v12 = vld [vmem:[#allocation5 + $0x184] ss:$8 sps:$4 sm:$0xff]   ;;  %v1824_v13 = vld [vmem:[#allocation5 + $0x80] ss:$8 sps:$4 sm:$0xff]   ;;  %v1830_v15 = vld [vmem:[#allocation7 + $0x78] sm:$0xff]   ;;  %v2176_v17 = vshrl.u32 %v306_v16, 7 }
  0x59   : > { %v1827_v14 = vld [vmem:[#allocation5 + $0x180] ss:$8 sps:$4 sm:$0xff]   ;;  %v304_v22 = vld [vmem:[%s2289_s5] sm:$0xf]  ;;  %s1383_s16 = sshll.u32 %s287_s9, 4  ;;  %s2244_s28 = scalar_lea.sflag [#allocation4], %s285_s18  ;;  %s2242_s16 = int_to_ptr.vmem [resolvable:$true] %s1383_s16 }
  0x5a   : > { %v312_v18 = vsub.s32 1, %v2176_v17  ;;  %v320_v19 = vsub.s32 3, %v2176_v17  ;;  %v308_v20 = vsub.s32 0, %v2176_v17  ;;  %v316_v21 = vsub.s32 2, %v2176_v17  ;;  %s1948_s25 = scalar_lea.vmem %s2242_s16, 512  ;;  %p2301_p3 = scmp.ne.s32.totalorder %s2293_s7, 0 }
  0x5b   : > { %891 = vmatpush1.bf16.msra.mxu0 %v1758_v33  ;;  %944 = vmatpush1.bf16.msra.mxu1 %v1761_v34  ;;  %p1949_p10 = scmp.ne.s32.totalorder %s2242_s16, %s1948_s25  ;;  %s2026_s29 = smov [#allocation8]  }
  0x5c   : > { %892 = vmatprep.subr.bf16.mxu0 %v1766_v35  ;;  %945 = vmatprep.subr.bf16.mxu1 %v1769_v36  ;;  %v313_v25 = vrot.slane %v304_v22, %v312_v18  ;;  %v321_v26 = vrot.slane %v304_v22, %v320_v19  ;;  %v309_v27 = vrot.slane %v304_v22, %v308_v20  ;;  %s1952_s10 = sshll.u32 %s2026_s29, 4  ;;  %s1953_s10 = int_to_ptr.vmem [resolvable:$false] %s1952_s10 }
  0x5d   : > { %v317_v28 = vrot.slane %v304_v22, %v316_v21  ;;  %p1950_p2 = pnand %p1949_p10, %p2301_p3  ;;  %s1954_s11 = scalar_lea.vmem %s1953_s10, 1024 }
  0x5e   : > { %p1955_p7 = scmp.lt.s32.totalorder %s2242_s16, %s1953_s10  ;;  %p1956_p8 = scmp.lt.s32.totalorder %s1954_s11, %s1948_s25 }
  0x5f   : > { %893 = vmatpush1.bf16.msra.mxu0 %v1764_v37  ;;  %946 = vmatpush1.bf16.msra.mxu1 %v1767_v38  ;;  %p1951_p4 = pneg %p1950_p2 }
  0x60   : > { %894 = vmatprep.subr.bf16.mxu0 %v1772_v39  ;;  %947 = vmatprep.subr.bf16.mxu1 %v1775_v40  ;;  %p1957_p11 = por %p1956_p8, %p1955_p7 }
  0x62   : > { %p1958_p0 = pnand %p1957_p11, %p1951_p4 }
  0x63   : > { %895 = vmatpush1.bf16.msra.mxu0 %v1770_v41  ;;  %948 = vmatpush1.bf16.msra.mxu1 %v1773_v42 }
  0x64   : > { %896 = vmatprep.subr.bf16.mxu0 %v1778_v43  ;;  %949 = vmatprep.subr.bf16.mxu1 %v1781_v44 }
  0x67   : > { %897 = vmatpush1.bf16.msra.mxu0 %v1776_v45  ;;  %950 = vmatpush1.bf16.msra.mxu1 %v1779_v46 }
  0x68   : > { %898 = vmatprep.subr.bf16.mxu0 %v1784_v47  ;;  %951 = vmatprep.subr.bf16.mxu1 %v1787_v48 }
  0x6b   : > { %899 = vmatpush2.bf16.msra.mxu0 %v1782_v49  ;;  %952 = vmatpush2.bf16.msra.mxu1 %v1785_v50 }
  0x6c   : > { %900 = vmatprep.subr.bf16.mxu0 %v1790_v51  ;;  %953 = vmatprep.subr.bf16.mxu1 %v1793_v52 }
  0x6f   : > { %901 = vmatpush2.bf16.msra.mxu0 %v1788_v53  ;;  %954 = vmatpush2.bf16.msra.mxu1 %v1791_v54 }
  0x70   : > { %902 = vmatprep.subr.bf16.mxu0 %v1796_v55  ;;  %955 = vmatprep.subr.bf16.mxu1 %v1799_v56 }
  0x73   : > { %903 = vmatpush2.bf16.msra.mxu0 %v1794_v57  ;;  %956 = vmatpush2.bf16.msra.mxu1 %v1797_v58  ;;  %v1831_v57 = vld [vmem:[#allocation7 + $0x38] sm:$0xff]  }
  0x74   : > { %904 = vmatprep.subr.bf16.mxu0 %v1802_v59  ;;  %957 = vmatprep.subr.bf16.mxu1 %v1805_v60 }
  0x77   : > { %905 = vmatpush2.bf16.msra.mxu0 %v1800_v61  ;;  %958 = vmatpush2.bf16.msra.mxu1 %v1803_v62 }
  0x78   : > { %906 = vmatprep.subr.bf16.mxu0 %v1808_v63  ;;  %959 = vmatprep.subr.bf16.mxu1 %v1811_v0  ;;  %v1832_v63 = vld [vmem:[#allocation7 + $0x70] sm:$0xff]  }
  0x7b   : > { %907 = vmatpush2.bf16.msra.mxu0 %v1806_v1  ;;  %960 = vmatpush2.bf16.msra.mxu1 %v1809_v2 }
  0x7c   : > { %908 = vmatprep.subr.bf16.mxu0 %v1814_v3  ;;  %961 = vmatprep.subr.bf16.mxu1 %v1817_v4 }
  0x7f   : > { %909 = vmatpush2.bf16.msra.mxu0 %v1812_v5  ;;  %962 = vmatpush2.bf16.msra.mxu1 %v1815_v6 }
  0x80   : > { %910 = vmatprep.subr.bf16.mxu0 %v1820_v7  ;;  %963 = vmatprep.subr.bf16.mxu1 %v1823_v8 }
  0x83   : > { %911 = vmatpush2.bf16.msra.mxu0 %v1818_v9  ;;  %964 = vmatpush2.bf16.msra.mxu1 %v1821_v10  ;;  %v1833_v9 = vld [vmem:[#allocation7 + $0x30] sm:$0xff]  }
  0x84   : > { %912 = vmatprep.subr.bf16.mxu0 %v1826_v11  ;;  %965 = vmatprep.subr.bf16.mxu1 %v1829_v12  ;;  %v1834_v12 = vld [vmem:[#allocation7 + $0x68] sm:$0xff]  }
  0x87   : > { %913 = vmatpush2.bf16.msra.mxu0 %v1824_v13  ;;  %966 = vmatpush2.bf16.msra.mxu1 %v1827_v14 }
  0x88   : > { %1595 = vmatprep.subr.bf16.mxu0 %v1830_v15 }
 0x109   : > { %v390_v23 = vpop.f32.mrf.mxu0  ;;  %v443_v24 = vpop.f32.mrf.mxu1 }
 0x10a   : > { %v391_v37 = vadd.f32 %v390_v23, %v309_v27  ;;  %v444_v38 = vadd.f32 %v443_v24, %v317_v28 }
 0x10b   : > { %v392_v29 = vpop.f32.mrf.mxu0  ;;  %v445_v30 = vpop.f32.mrf.mxu1 }
 0x10c   : > { %v393_v33 = vadd.f32 %v392_v29, %v313_v25  ;;  %v446_v34 = vadd.f32 %v445_v30, %v321_v26  ;;  %v462_v51 = vmax.f32 %v391_v37, 0.0  ;;  %v464_v52 = vmax.f32 %v444_v38, 0.0  ;;  %v1838_v30 = vld [vmem:[#allocation7 + $0x58] sm:$0xff]   ;;  %v1845_v37 = vld [vmem:[#allocation7] sm:$0xff]   ;;  %v1846_v38 = vld [vmem:[%s2288_s4 + $0x38] sm:$0xff]  }
 0x10d   : > { %v394_v31 = vpop.f32.mrf.mxu0  ;;  %v447_v32 = vpop.f32.mrf.mxu1  ;;  %1633 = vmatprep.subr.bf16.mxu1 %v1846_v38 }
 0x10e   : > { %v395_v35 = vadd.f32 %v394_v31, %v309_v27  ;;  %v448_v36 = vadd.f32 %v447_v32, %v317_v28  ;;  %v463_v47 = vmax.f32 %v393_v33, 0.0  ;;  %v465_v48 = vmax.f32 %v446_v34, 0.0  ;;  %v1839_v31 = vld [vmem:[#allocation7 + $0x18] sm:$0xff]   ;;  %v1840_v32 = vld [vmem:[#allocation7 + $0x50] sm:$0xff]   ;;  %v1842_v34 = vld [vmem:[#allocation7 + $0x48] sm:$0xff]  }
 0x10f   : > { %v396_v39 = vpop.f32.mrf.mxu0  ;;  %v449_v40 = vpop.f32.mrf.mxu1  ;;  %v1841_v33 = vld [vmem:[#allocation7 + $0x10] sm:$0xff]  }
 0x110   : > { %v397_v41 = vadd.f32 %v396_v39, %v313_v25  ;;  %v450_v42 = vadd.f32 %v449_v40, %v321_v26  ;;  %v466_v43 = vmax.f32 %v395_v35, 0.0  ;;  %v468_v44 = vmax.f32 %v448_v36, 0.0  ;;  %v1843_v35 = vld [vmem:[#allocation7 + $0x8] sm:$0xff]   ;;  %v1844_v36 = vld [vmem:[#allocation7 + $0x40] sm:$0xff]   ;;  %v1848_v40 = vld [vmem:[%s2288_s4 + $0x28] sm:$0xff]  }
 0x111   : > { %v400_v45 = vpop.f32.mrf.mxu0  ;;  %v453_v46 = vpop.f32.mrf.mxu1  ;;  %v1847_v39 = vld [vmem:[%s2288_s4 + $0x30] sm:$0xff]  }
 0x112   : > { %v467_v49 = vmax.f32 %v397_v41, 0.0  ;;  %v469_v50 = vmax.f32 %v450_v42, 0.0  ;;  %v478_v58 = vpack.c.bf16 %v466_v43, %v462_v51  ;;  %v480_v59 = vpack.c.bf16 %v468_v44, %v464_v52  ;;  %v550_v41 = vld [vmem:[%s2289_s5 + $0x4] sm:$0x3] }
 0x113   : > { %v402_v53 = vpop.f32.mrf.mxu0  ;;  %v455_v54 = vpop.f32.mrf.mxu1  ;;  %v401_v3 = vadd.f32 %v400_v45, %v309_v27  ;;  %v454_v4 = vadd.f32 %v453_v46, %v317_v28  ;;  %v559_v42 = vrot.slane %v550_v41, %v312_v18  ;;  %v555_v43 = vrot.slane %v550_v41, %v308_v20 }
 0x114   : > { %v479_v55 = vpack.c.bf16 %v467_v49, %v463_v47  ;;  %v481_v56 = vpack.c.bf16 %v469_v50, %v465_v48  ;;  %v403_v60 = vadd.f32 %v402_v53, %v313_v25  ;;  %v456_v0 = vadd.f32 %v455_v54, %v321_v26 }
 0x115   : > { %v404_v61 = vpop.f32.mrf.mxu0  ;;  %v457_v62 = vpop.f32.mrf.mxu1  ;;  %v470_v21 = vmax.f32 %v401_v3, 0.0  ;;  %v472_v22 = vmax.f32 %v454_v4, 0.0 }
 0x116   : > { %v405_v1 = vadd.f32 %v404_v61, %v309_v27  ;;  %v458_v2 = vadd.f32 %v457_v62, %v317_v28  ;;  %914 = vmatprep.mubr.bf16.mxu0 %v479_v55  ;;  %967 = vmatprep.mubr.bf16.mxu1 %v481_v56  ;;  %v471_v13 = vmax.f32 %v403_v60, 0.0  ;;  %v473_v14 = vmax.f32 %v456_v0, 0.0  ;;  %v1835_v27 = vld [vmem:[#allocation7 + $0x28] sm:$0xff]  }
 0x117   : > { %v406_v5 = vpop.f32.mrf.mxu0  ;;  %v459_v6 = vpop.f32.mrf.mxu1  ;;  %915 = vmatmul.mubr.bf16.vlgmr.msra.gmra.mxu0 %v478_v58  ;;  %968 = vmatmul.mubr.bf16.vlgmr.msra.gmra.mxu1 %v480_v59 }
 0x118   : > { %v407_v7 = vadd.f32 %v406_v5, %v313_v25  ;;  %v460_v8 = vadd.f32 %v459_v6, %v321_v26  ;;  %1596 = vmatpush3.bf16.msra.mxu0 %v1831_v57  ;;  %v474_v10 = vmax.f32 %v405_v1, 0.0  ;;  %v476_v11 = vmax.f32 %v458_v2, 0.0  ;;  %v1836_v25 = vld [vmem:[#allocation7 + $0x60] sm:$0xff]   ;;  %1634 = vmatpush3.bf16.msra.mxu1 %v1846_v38 }
 0x119   : > { %1597 = vmatprep.subr.bf16.mxu0 %v1832_v63  ;;  %v1837_v26 = vld [vmem:[#allocation7 + $0x20] sm:$0xff]   ;;  %1635 = vmatprep.subr.bf16.mxu1 %v1847_v39 }
 0x11a   : > { %v475_v15 = vmax.f32 %v407_v7, 0.0  ;;  %v477_v19 = vmax.f32 %v460_v8, 0.0  ;;  %v482_v28 = vpack.c.bf16 %v474_v10, %v470_v21  ;;  %v484_v29 = vpack.c.bf16 %v476_v11, %v472_v22 }
 0x11c   : > { %v483_v23 = vpack.c.bf16 %v475_v15, %v471_v13  ;;  %v485_v24 = vpack.c.bf16 %v477_v19, %v473_v14  ;;  %1598 = vmatpush3.bf16.msra.mxu0 %v1833_v9  ;;  %1636 = vmatpush3.bf16.msra.mxu1 %v1847_v39 }
 0x11d   : > { %1599 = vmatprep.subr.bf16.mxu0 %v1834_v12  ;;  %1637 = vmatprep.subr.bf16.mxu1 %v1848_v40 }
 0x11e   : > { %924 = vmatprep.mubr.bf16.mxu0 %v483_v23  ;;  %977 = vmatprep.mubr.bf16.mxu1 %v485_v24 }
 0x11f   : > { %925 = vmatmul.mubr.bf16.gmra.mxu0 %v482_v28  ;;  %978 = vmatmul.mubr.bf16.gmra.mxu1 %v484_v29  ;;  %v1850_v28 = vld [vmem:[%s2288_s4 + $0x18] sm:$0xff]   ;;  %v1851_v29 = vld [vmem:[%s2288_s4 + $0x10] sm:$0xff]  }
 0x120   : > { %1600 = vmatpush3.bf16.msra.mxu0 %v1835_v27  ;;  %1638 = vmatpush3.bf16.msra.mxu1 %v1848_v40  ;;  %v1849_v27 = vld [vmem:[%s2288_s4 + $0x20] sm:$0xff]  }
 0x121   : > { %1601 = vmatprep.subr.bf16.mxu0 %v1836_v25  ;;  %1639 = vmatprep.subr.bf16.mxu1 %v1849_v27  ;;  %v1852_v25 = vld [vmem:[%s2288_s4 + $0x8] sm:$0xff]  }
 0x124   : > { %1602 = vmatpush3.bf16.msra.mxu0 %v1837_v26  ;;  %1640 = vmatpush3.bf16.msra.mxu1 %v1849_v27  ;;  %v1853_v26 = vld [vmem:[%s2288_s4] sm:$0xff]  }
 0x125   : > { %1603 = vmatprep.subr.bf16.mxu0 %v1838_v30  ;;  %1641 = vmatprep.subr.bf16.mxu1 %v1850_v28 }
 0x128   : > { %1604 = vmatpush3.bf16.msra.mxu0 %v1839_v31  ;;  %1642 = vmatpush3.bf16.msra.mxu1 %v1850_v28 }
 0x129   : > { %1605 = vmatprep.subr.bf16.mxu0 %v1840_v32  ;;  %1643 = vmatprep.subr.bf16.mxu1 %v1851_v29 }
 0x12c   : > { %1606 = vmatpush3.bf16.msra.mxu0 %v1841_v33  ;;  %1644 = vmatpush3.bf16.msra.mxu1 %v1851_v29  ;;  %v1563_v33 = vld [vmem:[%s2289_s5 + $0x6] ss:$0 sm:$0xff] }
 0x12d   : > { %1607 = vmatprep.subr.bf16.mxu0 %v1842_v34  ;;  %1645 = vmatprep.subr.bf16.mxu1 %v1852_v25 }
 0x130   : > { %1608 = vmatpush3.bf16.msra.mxu0 %v1843_v35  ;;  %1646 = vmatpush3.bf16.msra.mxu1 %v1852_v25 }
 0x131   : > { %1609 = vmatprep.subr.bf16.mxu0 %v1844_v36  ;;  %1647 = vmatprep.subr.bf16.mxu1 %v1853_v26 }
 0x134   : > { %1610 = vmatpush3.bf16.msra.mxu0 %v1845_v37  ;;  %1648 = vmatpush3.bf16.msra.mxu1 %v1853_v26 }
 0x1d7   : > { %v916_v44 = vpop.f32.mrf.mxu0  ;;  %v969_v45 = vpop.f32.mrf.mxu1 }
 0x1d8   : > { %v917_v49 = vadd.f32 %v916_v44, %v555_v43 }
 0x1d9   : > { %v918_v46 = vpop.f32.mrf.mxu0  ;;  %v971_v47 = vpop.f32.mrf.mxu1 }
 0x1da   : > { %v919_v48 = vadd.f32 %v918_v46, %v559_v42  ;;  %v970_v58 = vadd.f32 %v969_v45, %v917_v49 }
 0x1db   : > { %v920_v50 = vpop.f32.mrf.mxu0  ;;  %v973_v51 = vpop.f32.mrf.mxu1 }
 0x1dc   : > { %v921_v52 = vadd.f32 %v920_v50, %v555_v43  ;;  %v972_v55 = vadd.f32 %v971_v47, %v919_v48  ;;  %v988_v1 = vmax.f32 %v970_v58, 0.0 }
 0x1dd   : > { %v922_v53 = vpop.f32.mrf.mxu0  ;;  %v975_v54 = vpop.f32.mrf.mxu1 }
 0x1de   : > { %v974_v56 = vadd.f32 %v973_v51, %v921_v52  ;;  %v923_v57 = vadd.f32 %v922_v53, %v559_v42  ;;  %v989_v62 = vmax.f32 %v972_v55, 0.0  ;;  %v1580_v53 = vld [vmem:[%s2289_s5 + $0x7] ss:$0 sm:$0xff] }
 0x1df   : > { %v926_v59 = vpop.f32.mrf.mxu0  ;;  %v979_v18 = vpop.f32.mrf.mxu1 }
 0x1e0   : > { %v976_v60 = vadd.f32 %v975_v54, %v923_v57  ;;  %v990_v17 = vmax.f32 %v974_v56, 0.0  ;;  %v927_v2 = vadd.f32 %v926_v59, %v555_v43  ;;  %v1315_v54 = vand.u32 127, %v306_v16 }
 0x1e1   : > { %v928_v20 = vpop.f32.mrf.mxu0  ;;  %v981_v61 = vpop.f32.mrf.mxu1 }
 0x1e2   : > { %v991_v63 = vmax.f32 %v976_v60, 0.0  ;;  %v929_v0 = vadd.f32 %v928_v20, %v559_v42  ;;  %v996_v7 = vpack.c.bf16 %v990_v17, %v988_v1  ;;  %v980_v12 = vadd.f32 %v979_v18, %v927_v2 }
 0x1e3   : > { %v930_v3 = vpop.f32.mrf.mxu0  ;;  %v983_v4 = vpop.f32.mrf.mxu1  ;;  %vm1316_vm2 = vcmp.lt.s32.totalorder %v1315_v54, 4 }
 0x1e4   : > { %v997_v5 = vpack.c.bf16 %v991_v63, %v989_v62  ;;  %v931_v6 = vadd.f32 %v930_v3, %v555_v43  ;;  %v982_v9 = vadd.f32 %v981_v61, %v929_v0  ;;  %v992_v22 = vmax.f32 %v980_v12, 0.0 }
 0x1e5   : > { %v932_v8 = vpop.f32.mrf.mxu0  ;;  %v985_v13 = vpop.f32.mrf.mxu1 }
 0x1e6   : > { %v984_v10 = vadd.f32 %v983_v4, %v931_v6  ;;  %v933_v11 = vadd.f32 %v932_v8, %v559_v42  ;;  %1167 = vmatprep.mubr.bf16.mxu0 %v997_v5  ;;  %v993_v19 = vmax.f32 %v982_v9, 0.0 }
 0x1e7   : > { %1168 = vmatmul.mubr.bf16.vlgmr.msra.gmra.mxu0 %v996_v7 }
 0x1e8   : > { %v986_v14 = vadd.f32 %v985_v13, %v933_v11  ;;  %v994_v15 = vmax.f32 %v984_v10, 0.0 }
 0x1ea   : > { %v995_v21 = vmax.f32 %v986_v14, 0.0  ;;  %v998_v24 = vpack.c.bf16 %v994_v15, %v992_v22 }
 0x1ec   : > { %v999_v23 = vpack.c.bf16 %v995_v21, %v993_v19 }
 0x1ee   : > { %1175 = vmatprep.mubr.bf16.mxu0 %v999_v23 }
 0x1ef   : > { %1176 = vmatmul.mubr.bf16.gmra.mxu0 %v998_v24 }
 0x2a7   : > { %v1611_v30 = vpop.f32.mrf.mxu0 }
 0x2a9   : > { %v1612_v31 = vpop.f32.mrf.mxu0 }
 0x2aa   : > { %v1613_v32 = vadd.f32 %v1612_v31, %v1611_v30 }
 0x2ab   : > { %v1614_v34 = vpop.f32.mrf.mxu0 }
 0x2ac   : > { %v1170_v36 = vadd.f32 %v1613_v32, %v1563_v33 }
 0x2ad   : > { %v1615_v35 = vpop.f32.mrf.mxu0 }
 0x2ae   : > { %v1616_v37 = vadd.f32 %v1615_v35, %v1614_v34  ;;  %v1184_v41 = vmax.f32 %v1170_v36, 0.0 }
 0x2af   : > { %v1617_v38 = vpop.f32.mrf.mxu0 }
 0x2b0   : > { %v1173_v39 = vadd.f32 %v1616_v37, %v1563_v33 }
 0x2b1   : > { %v1618_v40 = vpop.f32.mrf.mxu0 }
 0x2b2   : > { %v1185_v42 = vmax.f32 %v1173_v39, 0.0  ;;  %v1619_v43 = vadd.f32 %v1618_v40, %v1617_v38 }
 0x2b3   : > { %v1620_v44 = vpop.f32.mrf.mxu0 }
 0x2b4   : > { %v1188_v45 = vpack.c.bf16 %v1185_v42, %v1184_v41  ;;  %v1178_v47 = vadd.f32 %v1619_v43, %v1563_v33 }
 0x2b5   : > { %v1621_v46 = vpop.f32.mrf.mxu0 }
 0x2b6   : > { %v1622_v48 = vadd.f32 %v1621_v46, %v1620_v44  ;;  %1649 = vmatprep.mubr.bf16.mxu1 %v1188_v45  ;;  %v1186_v50 = vmax.f32 %v1178_v47, 0.0 }
 0x2b8   : > { %v1181_v49 = vadd.f32 %v1622_v48, %v1563_v33 }
 0x2ba   : > { %v1187_v51 = vmax.f32 %v1181_v49, 0.0 }
 0x2bc   : > { %v1189_v52 = vpack.c.bf16 %v1187_v51, %v1186_v50 }
 0x2be   : > { %1650 = vmatmul.mubr.bf16.vlgmr.msra.gmra.mxu1 %v1189_v52 }
 0x37e   : > { %v1651_v55 = vpop.f32.mrf.mxu1 }
 0x37f   : > { %v1304_v56 = vadd.f32 %v1651_v55, %v1580_v53 }
 0x380   : > { %v1295_v57 = vpop.f32.mrf.mxu1 }
 0x381   : > { %v1312_v58 = vmax.f32 %v1304_v56, 0.0  ;;  %v1296_v59 = vadd.f32 %v1580_v53, %v1295_v57 }
 0x382   : > { %v1652_v18 = vpop.f32.mrf.mxu1 }
 0x383   : > { %v1310_v60 = vmax.f32 %v1296_v59, 0.0  ;;  %v1307_v17 = vadd.f32 %v1652_v18, %v1580_v53  ;;  %v1319_v20 = vsel %vm1316_vm2, %v1312_v58, -inf }
 0x384   : > { %1325 = vmax.xlane.f32.xlu1 %v1319_v20  ;;  %v1298_v61 = vpop.f32.mrf.mxu1 }
 0x385   : > { %v1313_v62 = vmax.f32 %v1307_v17, 0.0  ;;  %v1299_v63 = vadd.f32 %v1580_v53, %v1298_v61  ;;  %v1317_v0 = vsel %vm1316_vm2, %v1310_v60, -inf }
 0x386   : > { %1321 = vmax.xlane.f32.xlu0 %v1317_v0 }
 0x387   : > { %v1311_v1 = vmax.f32 %v1299_v63, 0.0  ;;  %v1320_v16 = vsel %vm1316_vm2, %v1313_v62, -inf }
 0x388   : > { %1327 = vmax.xlane.f32.xlu1 %v1320_v16 }
 0x389   : > { %v1318_v2 = vsel %vm1316_vm2, %v1311_v1, -inf }
 0x38a   : > { %1323 = vmax.xlane.f32.xlu0 %v1318_v2 }
 0x40d   : > { %v1326_v3 = vpop.xlane.xlu1 %1325 }
 0x40e   : > { %v1331_v4 = vsub.f32 %v1319_v20, %v1326_v3 }
 0x40f   : > { %v1322_v5 = vpop.xlane.xlu0 %1321 }
 0x410   : > { %v1329_v6 = vsub.f32 %v1317_v0, %v1322_v5  ;;  %v1337_v8 = vmul.f32 1.442695, %v1331_v4 }
 0x411   : > { %v1328_v7 = vpop.xlane.xlu1 %1327 }
 0x412   : > { %v1333_v9 = vmul.f32 1.442695, %v1329_v6  ;;  %v1332_v10 = vsub.f32 %v1320_v16, %v1328_v7 }
 0x413   : > { %v1324_v11 = vpop.xlane.xlu0 %1323 }
 0x414   : > { %1854 = vpow2.f32 %v1333_v9  ;;  %v1330_v12 = vsub.f32 %v1318_v2, %v1324_v11  ;;  %v1339_v13 = vmul.f32 1.442695, %v1332_v10 }
 0x415   : > { %1856 = vpow2.f32 %v1337_v8 }
 0x416   : > { %v1335_v14 = vmul.f32 1.442695, %v1330_v12 }
 0x418   : > { %1858 = vpow2.f32 %v1335_v14 }
 0x419   : > { %1860 = vpow2.f32 %v1339_v13 }
 0x421   : > { %v1855_v15 = vpop.eup %1854 }
 0x422   : > { %v1341_v19 = vsel %vm1316_vm2, %v1855_v15, 0.0  ;;  %v1857_v21 = vpop.eup %1856 }
 0x423   : > { %1345 = vadd.xlane.f32.xlu0 %v1341_v19  ;;  %v1343_v23 = vsel %vm1316_vm2, %v1857_v21, 0.0 }
 0x425   : > { %v1859_v22 = vpop.eup %1858 }
 0x426   : > { %v1342_v24 = vsel %vm1316_vm2, %v1859_v22, 0.0  ;;  %v1861_v27 = vpop.eup %1860 }
 0x427   : > { %1349 = vadd.xlane.f32.xlu0 %v1343_v23  ;;  %1347 = vadd.xlane.f32.xlu1 %v1342_v24  ;;  %v1344_v28 = vsel %vm1316_vm2, %v1861_v27, 0.0 }
 0x42b   : > { %1351 = vadd.xlane.f32.xlu1 %v1344_v28 }
 0x4ac   : > { %v1346_v29 = vpop.xlane.xlu0 %1345 }
 0x4ad   : > { %1862 = vrcp.f32 %v1346_v29 }
 0x4b0   : > { %v1348_v25 = vpop.xlane.xlu1 %1347  ;;  %v1350_v26 = vpop.xlane.xlu0 %1349 }
 0x4b1   : > { %1864 = vrcp.f32 %v1348_v25 }
 0x4b2   : > { %1866 = vrcp.f32 %v1350_v26 }
 0x4b4   : > { %v1352_v30 = vpop.xlane.xlu1 %1351 }
 0x4b5   : > { %1868 = vrcp.f32 %v1352_v30 }
 0x4ba   : > { %v1863_v31 = vpop.eup %1862 }
 0x4bb   : > { %v1357_v32 = vmul.f32 %v1863_v31, %v1341_v19 }
 0x4bd   : > { %v1361_v33 = vmax.f32 %v1357_v32, 1.1920929e-07 }
 0x4be   : > { %v1865_v34 = vpop.eup %1864 }
 0x4bf   : > { %v1867_v35 = vpop.eup %1866  ;;  %1365 = vst [vmem:[%s287_s9] sm:$0xff] %v1361_v33  ;;  %v1358_v36 = vmul.f32 %v1865_v34, %v1342_v24 }
 0x4c0   : > { %v1359_v37 = vmul.f32 %v1867_v35, %v1343_v23 }
 0x4c1   : > { %v1362_v38 = vmax.f32 %v1358_v36, 1.1920929e-07 }
 0x4c2   : > { %v1869_v39 = vpop.eup %1868  ;;  %v1363_v40 = vmax.f32 %v1359_v37, 1.1920929e-07 }
 0x4c3   : > { %1366 = vst [vmem:[%s287_s9 + $0x8] sm:$0xff] %v1362_v38  ;;  %v1360_v41 = vmul.f32 %v1869_v39, %v1344_v28 }
 0x4c4   : > { %1367 = vst [vmem:[%s287_s9 + $0x10] sm:$0xff] %v1363_v40 }
 0x4c5   : > { %v1364_v42 = vmax.f32 %v1360_v41, 1.1920929e-07 }
 0x4c7   : > { %1368 = vst [vmem:[%s287_s9 + $0x18] sm:$0xff] %v1364_v42 }
 0x4c8   : > { %1961 = shalt.err (!%p1958_p0)
}
 0x4c9   : > { %s1962_s13 = scalar_lea.hbm %s2240_s26, 512  ;;  %s1966_s18 = scalar_lea.hbm %s2290_s6, 1024 }
 0x4ca   : > { %p1963_p6 = scmp.ne.s32.totalorder %s2240_s26, %s1962_s13  ;;  %p1967_p5 = scmp.lt.s32.totalorder %s2240_s26, %s2290_s6 }
 0x4cb   : > { %p1968_p1 = scmp.lt.s32.totalorder %s1966_s18, %s1962_s13 }
 0x4cc   : > { %p1964_p9 = pnand %p1963_p6, %p2301_p3 }
 0x4cd   : > { %p1969_p12 = por %p1968_p1, %p1967_p5 }
 0x4ce   : > { %p1965_p13 = pneg %p1964_p9 }
 0x4d0   : > { %p1970_p10 = pnand %p1969_p12, %p1965_p13 }
 0x4d2   : > { %1973 = shalt.err (!%p1970_p10)
}
 0x4d3   : > { %s2027_s14 = smov 128   ;;  %s2028_s19 = smov 8  }
 0x4d4   : > { %1665 = dma.vmem_to_hbm [thread:$0]  (%p2301_p3), %s2242_s16, 512, %s2240_s26, %s2244_s28, %s2027_s14, %s2027_s14, %s2028_s19  }
 0x4d5 PF: > { %p1687_p2 = scmp.ge.s32.totalorder %s2016_s24, 2  ;;  %s1398_s20 = sand.u32 1, %s2004_s21  }
 0x4d6   : > { %p2302_p4 = scmp.ne.s32.totalorder %s2294_s8, 0  ;;  %s1399_s25 = scalar_lea.sflag [#allocation4], %s1398_s20 }
 0x4d8   : > { %p1678_p7 = pnand %p1687_p2, %p2302_p4 }
 0x4da   : > { %p1679_p8 = pneg %p1678_p7 }
 0x4dc   : > { %1999 = dma.done.wait (%p1679_p8), %s1399_s25, 512  }
 0x4dd   : > { %2001 = vsyncadd (%p1679_p8), %s1399_s25, 4294966784  ;;  %p18_p11 = scmp.ge.s32.totalorder %s2089_s27, 4   ;;  %s2303_s21 = smov %s2008_s22 }
 0x4de   : > { %s2304_s22 = smov %s2012_s23  ;;  %s2305_s23 = smov %s2100_s30 }
 0x4df   : > { %s2306_s24 = smov %s2089_s27  ;;  %20 = sbr.rel (!%p18_p11) target bundleno = 5 (0x5), region = 92 }
 0x4e4   :  { %1404 = vsyncpa [#allocation3], 1 }
 0x4e5   :  { %1406 = vsyncpa [#allocation3 + $0x1], 1 }
 0x4e6   :  { %1407 = vsyncpa [#allocation6], 1 }
 0x4e7   :  { %1408 = vsyncpa [#allocation4], 1 }
 0x4e8   :  { %1410 = vsyncpa [#allocation4 + $0x1], 1 }

</bundles_post_ra>
